<compile_context>
chip_gen: v6e
topology: v6e:2x2x1
jax: 0.10.0
libtpu: 0.0.40
codegen_flags: <defaults>
</compile_context>

<pallas_src>
import functools
from typing import NamedTuple

import jax
import jax.numpy as jnp
from jax.experimental import pallas as pl
from jax.experimental.pallas import tpu as pltpu

EPS = 1e-5  # nn.BatchNorm1d default eps

# Column indices of the per-feature parameter columns inside the slab's column block.
_COL_G1, _COL_BE1, _COL_G2, _COL_BE2, _COL_B3 = 0, 1, 2, 3, 4


def _round_up(n, m):
    return ((n + m - 1) // m) * m


class _SlabLayout(NamedTuple):
    d_in_pad: int   # input dim padded to a multiple of 8 (x gets a zero column)
    off_w1: int     # rows [off_w1, off_w1+h1): w1 [h1, d_in] in cols [0, d_in_pad)
    off_w2: int     # rows [off_w2, off_w2+h2): w2 [h2, h1]   in cols [0, h1)
    off_w3: int     # rows [off_w3, off_w3+d_out): w3 [d_out, h2] in cols [0, h2)
    off_cols: int   # rows [off_cols, ...): per-feature params stored as COLUMNS
    rows: int       # total slab rows (multiple of 8)
    width: int      # slab lane width


def _slab_layout(d_in, h1, h2, d_out):
    d_in_pad = _round_up(d_in, 8)
    h1_pad = _round_up(h1, 8)
    h2_pad = _round_up(h2, 8)
    d_out_pad = _round_up(d_out, 8)
    off_w1 = 0
    off_w2 = off_w1 + h1_pad
    off_w3 = off_w2 + h2_pad
    off_cols = off_w3 + d_out_pad                       # 8-aligned static offsets
    rows = _round_up(off_cols + max(h1_pad, h2_pad, d_out_pad), 8)
    width = max(d_in_pad, h1_pad, h2_pad, 8)
    return _SlabLayout(d_in_pad, off_w1, off_w2, off_w3, off_cols, rows, width)


def _bn_relu(h, gamma_col, beta_col):
    """Training-mode BatchNorm1d (stats over the batch = lane axis) + ReLU.

    Fused scale/shift with centered (cancellation-safe) biased variance:
      mu  = mean_b(h),  var = mean_b((h - mu)^2)
      s = gamma * rsqrt(var + eps),  t = beta - mu * s,   out = relu(h*s + t)
    """
    mu = jnp.mean(h, axis=1, keepdims=True)             # (features, 1), lane reduce
    d = h - mu
    var = jnp.mean(d * d, axis=1, keepdims=True)
    s = gamma_col * jax.lax.rsqrt(var + EPS)
    t = beta_col - mu * s
    return jnp.maximum(h * s + t, 0.0)


def _fccondgen_kernel(xt_ref, slab_ref, out_ref, *, layout, dims):
    """One generation batch per grid step.  xt_ref: (d_in_pad, B) — batch on lanes."""
    d_in, h1, h2, d_out = dims
    L = layout
    xT = xt_ref[...]                                                   # (d_in_pad, B)

    # fc1 (bias cancelled by training-mode bn1) + bn1 + relu
    w1 = slab_ref[L.off_w1:L.off_w1 + h1, 0:L.d_in_pad]                # (h1, d_in_pad)
    g1 = slab_ref[L.off_cols:L.off_cols + h1, _COL_G1:_COL_G1 + 1]     # (h1, 1)
    be1 = slab_ref[L.off_cols:L.off_cols + h1, _COL_BE1:_COL_BE1 + 1]
    h = jnp.dot(w1, xT, preferred_element_type=jnp.float32)            # (h1, B)
    h = _bn_relu(h, g1, be1)

    # fc2 (bias cancelled by training-mode bn2) + bn2 + relu
    w2 = slab_ref[L.off_w2:L.off_w2 + h2, 0:h1]                        # (h2, h1)
    g2 = slab_ref[L.off_cols:L.off_cols + h2, _COL_G2:_COL_G2 + 1]
    be2 = slab_ref[L.off_cols:L.off_cols + h2, _COL_BE2:_COL_BE2 + 1]
    h = jnp.dot(w2, h, preferred_element_type=jnp.float32)             # (h2, B)
    h = _bn_relu(h, g2, be2)

    # fc3 (+ bias, no BN after it) + sigmoid(z) = 0.5*(tanh(z/2)+1)
    w3 = slab_ref[L.off_w3:L.off_w3 + d_out, 0:h2]                     # (d_out, h2)
    b3 = slab_ref[L.off_cols:L.off_cols + d_out, _COL_B3:_COL_B3 + 1]  # (d_out, 1)
    h = jnp.dot(w3, h, preferred_element_type=jnp.float32) + b3        # (d_out, B)
    out_ref[...] = 0.5 * (jnp.tanh(0.5 * h) + 1.0)


def pack_params(params):
    """One-time repack of the module's 10 tensors into (slab, dims).

    Weights are in PyTorch layout [out_features, in_features]; biases (out,),
    BN gamma/beta (features,).  fc1/fc2 biases are discarded (cancelled by the
    per-batch mean subtraction of training-mode BN); fc3's bias is kept.
    """
    w1, b1, g1, be1, w2, b2, g2, be2, w3, b3 = params
    del b1, b2  # algebraically cancelled by bn1 / bn2 (training-mode BN only)
    h1, d_in = w1.shape
    h2 = w2.shape[0]
    d_out = w3.shape[0]
    L = _slab_layout(d_in, h1, h2, d_out)

    slab = jnp.zeros((L.rows, L.width), jnp.float32)
    slab = slab.at[L.off_w1:L.off_w1 + h1, 0:d_in].set(w1.astype(jnp.float32))
    slab = slab.at[L.off_w2:L.off_w2 + h2, 0:h1].set(w2.astype(jnp.float32))
    slab = slab.at[L.off_w3:L.off_w3 + d_out, 0:h2].set(w3.astype(jnp.float32))
    slab = slab.at[L.off_cols:L.off_cols + h1, _COL_G1].set(g1.astype(jnp.float32))
    slab = slab.at[L.off_cols:L.off_cols + h1, _COL_BE1].set(be1.astype(jnp.float32))
    slab = slab.at[L.off_cols:L.off_cols + h2, _COL_G2].set(g2.astype(jnp.float32))
    slab = slab.at[L.off_cols:L.off_cols + h2, _COL_BE2].set(be2.astype(jnp.float32))
    slab = slab.at[L.off_cols:L.off_cols + d_out, _COL_B3].set(b3.astype(jnp.float32))
    return slab, (d_in, h1, h2, d_out)


def fccondgen_forward(x, slab, dims):
    """Forward pass.

    x:    (G, B, d_in) — G independent generation batches of B samples each — or
          (B, d_in) for a single batch.  BatchNorm statistics are computed per
          generation batch (training-mode semantics), matching G module calls.
    slab: packed parameter slab from pack_params.
    dims: static (d_in, h1, h2, d_out) tuple from pack_params.
    Returns (G, B, d_out) (or (B, d_out) for 2-D input), sigmoid range [0, 1].
    """
    d_in, h1, h2, d_out = dims
    L = _slab_layout(d_in, h1, h2, d_out)

    squeeze = x.ndim == 2
    if squeeze:
        x = x[None]
    G, B, xd = x.shape
    assert xd == d_in, (xd, d_in)

    x = x.astype(jnp.float32)
    if L.d_in_pad != d_in:  # zero column for the 7 -> 8 input pad
        x = jnp.pad(x, ((0, 0), (0, 0), (0, L.d_in_pad - d_in)))
    # Batch-on-lanes layout: (G, d_in_pad, B).  Transpose done here (XLA), not in-kernel.
    x_t = jnp.swapaxes(x, 1, 2)

    kernel = functools.partial(_fccondgen_kernel, layout=L, dims=dims)

    matmul_flops = 2 * B * (L.d_in_pad * h1 + h1 * h2 + h2 * d_out)
    elementwise_flops = B * (8 * h1 + 8 * h2 + 3 * d_out)
    cost = pl.CostEstimate(
        flops=int(G * (matmul_flops + elementwise_flops)),
        transcendentals=int(G * (B * d_out + h1 + h2)),   # tanh per output + rsqrt per feature
        bytes_accessed=int(4 * (x_t.size + G * d_out * B + slab.size)),
    )

    out_t = pl.pallas_call(
        kernel,
        out_shape=jax.ShapeDtypeStruct((G, d_out, B), jnp.float32),
        grid=(G,),
        in_specs=[
            # One full generation batch per grid step (keeps BN stats per batch);
            # leading dim squeezed so the kernel sees a 2-D (d_in_pad, B) ref.
            pl.BlockSpec((None, L.d_in_pad, B), lambda g: (g, 0, 0)),
            # Parameter slab: constant block index -> DMA'd once, VMEM-resident.
            pl.BlockSpec((L.rows, L.width), lambda g: (0, 0)),
        ],
        out_specs=pl.BlockSpec((None, d_out, B), lambda g: (g, 0, 0)),
        compiler_params=pltpu.CompilerParams(
            dimension_semantics=("parallel",),          # megacore sharding on v7x
            vmem_limit_bytes=32 * 1024 * 1024,          # raise v5e's 16 MiB default
        ),
        cost_estimate=cost,
    )(x_t, slab)

    out = jnp.swapaxes(out_t, 1, 2)                     # back to (G, B, d_out)
    return out[0] if squeeze else out


def init_params(key, d_in, d_hid, d_out):
    """Deterministic params in PyTorch layout: Linear weight [out, in], bias [out]."""
    h1, h2 = d_hid
    ks = jax.random.split(key, 10)

    def linear(kw, kb, fan_in, fan_out):
        lim = 1.0 / jnp.sqrt(jnp.float32(fan_in))
        w = jax.random.uniform(kw, (fan_out, fan_in), jnp.float32, -lim, lim)
        b = jax.random.uniform(kb, (fan_out,), jnp.float32, -lim, lim)
        return w, b

    w1, b1 = linear(ks[0], ks[1], d_in, h1)
    w2, b2 = linear(ks[2], ks[3], h1, h2)
    w3, b3 = linear(ks[4], ks[5], h2, d_out)
    # Non-trivial BN affine params so the correctness check is meaningful
    # (PyTorch default init is gamma=1, beta=0).
    g1 = 1.0 + 0.1 * jax.random.normal(ks[6], (h1,), jnp.float32)
    be1 = 0.1 * jax.random.normal(ks[7], (h1,), jnp.float32)
    g2 = 1.0 + 0.1 * jax.random.normal(ks[8], (h2,), jnp.float32)
    be2 = 0.1 * jax.random.normal(ks[9], (h2,), jnp.float32)
    return (w1, b1, g1, be1, w2, b2, g2, be2, w3, b3)


def _reference_forward(x, params):
    """Pure-JAX reference matching the PyTorch module (training-mode BN, with biases)."""
    w1, b1, g1, be1, w2, b2, g2, be2, w3, b3 = params
    hi = jax.lax.Precision.HIGHEST

    def bn(h, g, be):
        mu = jnp.mean(h, axis=0, keepdims=True)
        var = jnp.mean((h - mu) ** 2, axis=0, keepdims=True)   # biased variance
        return (h - mu) * jax.lax.rsqrt(var + EPS) * g + be

    h = jnp.dot(x, w1.T, precision=hi) + b1
    h = jnp.maximum(bn(h, g1, be1), 0.0)
    h = jnp.dot(h, w2.T, precision=hi) + b2
    h = jnp.maximum(bn(h, g2, be2), 0.0)
    h = jnp.dot(h, w3.T, precision=hi) + b3
    return jax.nn.sigmoid(h)


if __name__ == "__main__":
    # Small shapes consistent with the module (2D synthetic-data generator):
    # d_code=5, n_labels=2 -> d_in=7; d_hid="32,32"; d_out=2.
    # Two generation batches of 8 samples each exercise the grid/pipelining path
    # while keeping BatchNorm statistics per logical batch.
    d_code, n_labels = 5, 2
    d_in = d_code + n_labels
    d_hid = (32, 32)
    d_out = 2
    n_gens, batch = 2, 8

    key = jax.random.PRNGKey(0)
    k_code, k_lab, k_p = jax.random.split(key, 3)

    # Build the generator input the same way get_code() does: [gaussian code | one-hot].
    code = jax.random.normal(k_code, (n_gens, batch, d_code), jnp.float32)
    labels = jax.random.randint(k_lab, (n_gens, batch), 0, n_labels)
    one_hot = jax.nn.one_hot(labels, n_labels, dtype=jnp.float32)
    x = jnp.concatenate([code, one_hot], axis=-1)          # (n_gens, batch, d_in)

    params = init_params(k_p, d_in, d_hid, d_out)
    slab, dims = pack_params(params)                       # one-time repack

    fwd = jax.jit(fccondgen_forward, static_argnames=("dims",))
    out = jax.block_until_ready(fwd(x, slab, dims=dims))

    assert out.shape == (n_gens, batch, d_out)
    assert bool(jnp.all(jnp.isfinite(out)))
    assert bool(jnp.all((out >= 0.0) & (out <= 1.0)))      # sigmoid output range

    # Correctness vs. pure-JAX reference (per-generation BatchNorm, biases included).
    ref = jax.vmap(lambda xb: _reference_forward(xb, params))(x)
    max_err = float(jnp.max(jnp.abs(out - ref)))
    assert bool(jnp.allclose(out, ref, rtol=1e-3, atol=1e-4)), max_err

    print("KERNEL_OK")
</pallas_src>

<mosaic_0001>
module attributes {stable_mosaic.version = 11 : i64} {
  func.func @_fccondgen_kernel(%arg0: i32, %arg1: memref<1x8x8xf32, #tpu.memory_space<vmem>>, %arg2: memref<104x32xf32, #tpu.memory_space<vmem>>, %arg3: memref<1x2x8xf32, #tpu.memory_space<vmem>>) attributes {dimension_semantics = [#tpu.dimension_semantics<parallel>], iteration_bounds = array<i64: 2>, scalar_prefetch = 0 : i64, scratch_operands = 0 : i64, tpu.core_type = #tpu.core_type<tc>, window_params = [{transform_indices = @transform_0, window_bounds = array<i64: 1, 8, 8>}, {pipeline_mode = #tpu.pipeline_mode<synchronous>, transform_indices = @transform_1, window_bounds = array<i64: 104, 32>}, {transform_indices = @transform_2, window_bounds = array<i64: 1, 2, 8>}]} {
    %c0 = arith.constant 0 : index
    %c0_0 = arith.constant 0 : index
    %c0_1 = arith.constant 0 : index
    %0 = vector.load %arg1[%c0, %c0_0, %c0_1] : memref<1x8x8xf32, #tpu.memory_space<vmem>>, vector<1x8x8xf32>
    %1 = vector.shape_cast %0 : vector<1x8x8xf32> to vector<8x8xf32>
    %c0_2 = arith.constant 0 : index
    %c0_3 = arith.constant 0 : index
    %2 = vector.load %arg2[%c0_2, %c0_3] : memref<104x32xf32, #tpu.memory_space<vmem>>, vector<32x8xf32>
    %c72 = arith.constant 72 : index
    %c0_4 = arith.constant 0 : index
    %3 = vector.load %arg2[%c72, %c0_4] : memref<104x32xf32, #tpu.memory_space<vmem>>, vector<32x1xf32>
    %c72_5 = arith.constant 72 : index
    %c1 = arith.constant 1 : index
    %4 = vector.load %arg2[%c72_5, %c1] : memref<104x32xf32, #tpu.memory_space<vmem>>, vector<32x1xf32>
    %cst = arith.constant dense<0.000000e+00> : vector<32x8xf32>
    %5 = tpu.matmul %2, %1, %cst {dimension_numbers = #tpu.dot_dimension_numbers<[1], [0], [0], [1], [0, 0, 1, 1], [], []>} : vector<32x8xf32>, vector<8x8xf32>, vector<32x8xf32> -> vector<32x8xf32>
    %cst_6 = arith.constant dense<0.000000e+00> : vector<32xf32>
    %6 = vector.multi_reduction <add>, %5, %cst_6 [1] : vector<32x8xf32> to vector<32xf32>
    %7 = vector.shape_cast %6 : vector<32xf32> to vector<32x1xf32>
    %cst_7 = arith.constant 8.000000e+00 : f32
    %8 = vector.broadcast %cst_7 : f32 to vector<32x1xf32>
    %9 = arith.divf %7, %8 : vector<32x1xf32>
    %10 = vector.broadcast %9 : vector<32x1xf32> to vector<32x8xf32>
    %11 = arith.subf %5, %10 : vector<32x8xf32>
    %12 = arith.mulf %11, %11 : vector<32x8xf32>
    %cst_8 = arith.constant dense<0.000000e+00> : vector<32xf32>
    %13 = vector.multi_reduction <add>, %12, %cst_8 [1] : vector<32x8xf32> to vector<32xf32>
    %14 = vector.shape_cast %13 : vector<32xf32> to vector<32x1xf32>
    %cst_9 = arith.constant 8.000000e+00 : f32
    %15 = vector.broadcast %cst_9 : f32 to vector<32x1xf32>
    %16 = arith.divf %14, %15 : vector<32x1xf32>
    %cst_10 = arith.constant 9.99999974E-6 : f32
    %17 = vector.broadcast %cst_10 : f32 to vector<32x1xf32>
    %18 = arith.addf %16, %17 : vector<32x1xf32>
    %19 = math.rsqrt %18 : vector<32x1xf32>
    %20 = arith.mulf %3, %19 : vector<32x1xf32>
    %21 = arith.mulf %9, %20 : vector<32x1xf32>
    %22 = arith.subf %4, %21 : vector<32x1xf32>
    %23 = vector.broadcast %20 : vector<32x1xf32> to vector<32x8xf32>
    %24 = arith.mulf %5, %23 : vector<32x8xf32>
    %25 = vector.broadcast %22 : vector<32x1xf32> to vector<32x8xf32>
    %26 = arith.addf %24, %25 : vector<32x8xf32>
    %cst_11 = arith.constant 0.000000e+00 : f32
    %27 = vector.broadcast %cst_11 : f32 to vector<32x8xf32>
    %28 = arith.maximumf %26, %27 : vector<32x8xf32>
    %c32 = arith.constant 32 : index
    %c0_12 = arith.constant 0 : index
    %29 = vector.load %arg2[%c32, %c0_12] : memref<104x32xf32, #tpu.memory_space<vmem>>, vector<32x32xf32>
    %c72_13 = arith.constant 72 : index
    %c2 = arith.constant 2 : index
    %30 = vector.load %arg2[%c72_13, %c2] : memref<104x32xf32, #tpu.memory_space<vmem>>, vector<32x1xf32>
    %c72_14 = arith.constant 72 : index
    %c3 = arith.constant 3 : index
    %31 = vector.load %arg2[%c72_14, %c3] : memref<104x32xf32, #tpu.memory_space<vmem>>, vector<32x1xf32>
    %cst_15 = arith.constant dense<0.000000e+00> : vector<32x8xf32>
    %32 = tpu.matmul %29, %28, %cst_15 {dimension_numbers = #tpu.dot_dimension_numbers<[1], [0], [0], [1], [0, 0, 1, 1], [], []>} : vector<32x32xf32>, vector<32x8xf32>, vector<32x8xf32> -> vector<32x8xf32>
    %cst_16 = arith.constant dense<0.000000e+00> : vector<32xf32>
    %33 = vector.multi_reduction <add>, %32, %cst_16 [1] : vector<32x8xf32> to vector<32xf32>
    %34 = vector.shape_cast %33 : vector<32xf32> to vector<32x1xf32>
    %cst_17 = arith.constant 8.000000e+00 : f32
    %35 = vector.broadcast %cst_17 : f32 to vector<32x1xf32>
    %36 = arith.divf %34, %35 : vector<32x1xf32>
    %37 = vector.broadcast %36 : vector<32x1xf32> to vector<32x8xf32>
    %38 = arith.subf %32, %37 : vector<32x8xf32>
    %39 = arith.mulf %38, %38 : vector<32x8xf32>
    %cst_18 = arith.constant dense<0.000000e+00> : vector<32xf32>
    %40 = vector.multi_reduction <add>, %39, %cst_18 [1] : vector<32x8xf32> to vector<32xf32>
    %41 = vector.shape_cast %40 : vector<32xf32> to vector<32x1xf32>
    %cst_19 = arith.constant 8.000000e+00 : f32
    %42 = vector.broadcast %cst_19 : f32 to vector<32x1xf32>
    %43 = arith.divf %41, %42 : vector<32x1xf32>
    %cst_20 = arith.constant 9.99999974E-6 : f32
    %44 = vector.broadcast %cst_20 : f32 to vector<32x1xf32>
    %45 = arith.addf %43, %44 : vector<32x1xf32>
    %46 = math.rsqrt %45 : vector<32x1xf32>
    %47 = arith.mulf %30, %46 : vector<32x1xf32>
    %48 = arith.mulf %36, %47 : vector<32x1xf32>
    %49 = arith.subf %31, %48 : vector<32x1xf32>
    %50 = vector.broadcast %47 : vector<32x1xf32> to vector<32x8xf32>
    %51 = arith.mulf %32, %50 : vector<32x8xf32>
    %52 = vector.broadcast %49 : vector<32x1xf32> to vector<32x8xf32>
    %53 = arith.addf %51, %52 : vector<32x8xf32>
    %cst_21 = arith.constant 0.000000e+00 : f32
    %54 = vector.broadcast %cst_21 : f32 to vector<32x8xf32>
    %55 = arith.maximumf %53, %54 : vector<32x8xf32>
    %c64 = arith.constant 64 : index
    %c0_22 = arith.constant 0 : index
    %56 = vector.load %arg2[%c64, %c0_22] : memref<104x32xf32, #tpu.memory_space<vmem>>, vector<2x32xf32>
    %c72_23 = arith.constant 72 : index
    %c4 = arith.constant 4 : index
    %57 = vector.load %arg2[%c72_23, %c4] : memref<104x32xf32, #tpu.memory_space<vmem>>, vector<2x1xf32>
    %cst_24 = arith.constant dense<0.000000e+00> : vector<2x8xf32>
    %58 = tpu.matmul %56, %55, %cst_24 {dimension_numbers = #tpu.dot_dimension_numbers<[1], [0], [0], [1], [0, 0, 1, 1], [], []>} : vector<2x32xf32>, vector<32x8xf32>, vector<2x8xf32> -> vector<2x8xf32>
    %59 = vector.broadcast %57 : vector<2x1xf32> to vector<2x8xf32>
    %60 = arith.addf %58, %59 : vector<2x8xf32>
    %cst_25 = arith.constant 5.000000e-01 : f32
    %61 = vector.broadcast %cst_25 : f32 to vector<2x8xf32>
    %62 = arith.mulf %61, %60 : vector<2x8xf32>
    %63 = math.tanh %62 : vector<2x8xf32>
    %cst_26 = arith.constant 1.000000e+00 : f32
    %64 = vector.broadcast %cst_26 : f32 to vector<2x8xf32>
    %65 = arith.addf %63, %64 : vector<2x8xf32>
    %cst_27 = arith.constant 5.000000e-01 : f32
    %66 = vector.broadcast %cst_27 : f32 to vector<2x8xf32>
    %67 = arith.mulf %66, %65 : vector<2x8xf32>
    %c0_28 = arith.constant 0 : index
    %c0_29 = arith.constant 0 : index
    %c0_30 = arith.constant 0 : index
    %68 = vector.load %arg3[%c0_28, %c0_29, %c0_30] : memref<1x2x8xf32, #tpu.memory_space<vmem>>, vector<1x2x8xf32>
    %69 = vector.shape_cast %68 : vector<1x2x8xf32> to vector<2x8xf32>
    %70 = vector.shape_cast %67 : vector<2x8xf32> to vector<1x2x8xf32>
    tpu.vector_store %arg3[%c0_28, %c0_29, %c0_30], %70 {strides = array<i32>} : memref<1x2x8xf32, #tpu.memory_space<vmem>>, vector<1x2x8xf32>,
    return
  }
  func.func @transform_0(%arg0: i32) -> (i32, i32, i32) {
    %c0_i32 = arith.constant 0 : i32
    %c0_i32_0 = arith.constant 0 : i32
    %c0_i32_1 = arith.constant 0 : i32
    return %arg0, %c0_i32, %c0_i32_0 : i32, i32, i32
  }
  func.func @transform_1(%arg0: i32) -> (i32, i32) {
    %c0_i32 = arith.constant 0 : i32
    %c0_i32_0 = arith.constant 0 : i32
    %c0_i32_1 = arith.constant 0 : i32
    return %c0_i32, %c0_i32_0 : i32, i32
  }
  func.func @transform_2(%arg0: i32) -> (i32, i32, i32) {
    %c0_i32 = arith.constant 0 : i32
    %c0_i32_0 = arith.constant 0 : i32
    %c0_i32_1 = arith.constant 0 : i32
    return %arg0, %c0_i32, %c0_i32_0 : i32, i32, i32
  }
}

</mosaic_0001>

<bundles_post_ra>
// kernel: fccondgen_forward.1
= control target key start
LH: loop header
LB: loop body
LE: loop exit
PB: predicated region body
PF: predicated region fallthrough
CT: control target
= control target key end

     0   :  { %7 = vsyncpa [#allocation3], 0  ;;  %s1221_s0 = inlined_call_operand.vmem [shape: f32[2,8,8], index: 0, kind: input, shape index: {}]   ;;  %s1222_s1 = inlined_call_operand.vmem [shape: f32[104,32], index: 1, kind: input, shape index: {}]   ;;  %s1223_s2 = inlined_call_operand.hbm [shape: f32[2,2,8], index: 2, kind: output, shape index: {}]  }
   0x1   :  { %9 = vsyncpa [#allocation3 + $0x1], 0  ;;  %s995_s9 = smov 0   ;;  %s997_s10 = smov 0  }
   0x2   :  { %s999_s11 = smov 0   ;;  %s1001_s12 = smov 0  }
   0x3 LB: > { %s1016_s13 = sadd.s32 4294967295, %s969_s12   ;;  %s764_s14 = sadd.s32 4294967294, %s969_s12   ;;  %s969_s12 = sphi %s1001_s12, %s1229_s12   ;;  %s965_s11 = sphi %s999_s11, %s1228_s11   ;;  %s961_s10 = sphi %s997_s10, %s1227_s10   ;;  %s957_s9 = sphi %s995_s9, %s1226_s9  }
   0x4   : > { %s1020_s15 = sadd.s32 1, %s969_s12   ;;  %s69_s16 = sadd.s32 1, %s965_s11 }
   0x5   : > { %s66_s17 = ssub.s32 %s969_s12, %s1020_s15  ;;  %p79_p0 = scmp.ne.s32.totalorder %s965_s11, %s961_s10 }
   0x6   : > { %p67_p1 = scmp.eq.s32.totalorder %s66_s17, 0  ;;  %p80_p2 = scmp.eq.s32.totalorder %s1016_s13, 1 }
   0x7   : > { %p85_p3 = scmp.ne.s32.totalorder %s961_s10, %s957_s9  ;;  %p86_p4 = scmp.eq.s32.totalorder %s764_s14, 1 }
   0x8   : > { %s1031_s18 = scalar_select %p67_p1, %s965_s11, %s69_s16  }
   0x9   : > { %p1033_p5 = por %p80_p2, %p79_p0  ;;  %p1037_p6 = por %p86_p4, %p85_p3 }
   0xa   : > { %p767_p7 = scmp.ge.s32.totalorder %s969_s12, 1  ;;  %p114_p8 = scmp.lt.s32.totalorder %s969_s12, 3 }
   0xc   : > { %p115_p9 = pnand %p767_p7, %p114_p8 }
   0xd   : > { %p135_p10 = scmp.lt.s32.totalorder (!%p115_p9), %s1016_s13, 1  ;;  %s972_s16 = smov (!%p115_p9), 1  }
   0xe   : > { %118 = sbr.rel (%p115_p9) target bundleno = 1784 (0x6f8), region = 28  ;;  %s132_s8 = sand.u32 (!%p115_p9), 1, %s961_s10  }
   0xf   : > { %s768_s14 = sshll.u32 (!%p115_p9), %s132_s8, 1  ;;  %s692_s25 = scalar_lea.sflag (!%p115_p9), [#allocation3], %s132_s8 }
  0x10   : > { %s134_s17 = scalar_lea.vmem (!%p115_p9), [#allocation2], %s768_s14 }
  0x11   : > { %s705_s21 = sshll.u32 (!%p115_p9), %s134_s17, 4  ;;  %s706_s21 = int_to_ptr.vmem [resolvable:$true] %s705_s21 }
  0x12   : > { %s909_s26 = scalar_lea.vmem (!%p115_p9), %s706_s21, 32 }
  0x13   : > { %v140_v0 = vld [vmem:[%s1222_s1] sm:$0xff]  ;;  %vm148_vm0 = vcmask 64512   ;;  %s136_s23 = scalar_select %p135_p10, %s1016_s13, 1  ;;  %v141_v2 = vld [vmem:[%s1222_s1 + $0x8] sm:$0xff]  ;;  %v142_v3 = vld [vmem:[%s1222_s1 + $0x10] sm:$0xff]  ;;  %v971_v33 = vmov 0  }
  0x14   : > { %803 = vmatprep.mubr.msk.f32.mxu0 %vm148_vm0, %v140_v0  ;;  %v143_v4 = vld [vmem:[%s1222_s1 + $0x18] sm:$0xff]  ;;  %881 = vset.pattern.permute.xlu0 %v971_v33  ;;  %v1091_v46 = vld [vmem:[%s1222_s1 + $0x60] sm:$0xff]  ;;  %v1097_v50 = vld [vmem:[%s1222_s1 + $0x50] sm:$0xff]  ;;  %v973_v62 = vmov 1   ;;  %vm379_vm1 = vcmask 261120   ;;  %vm977_vm2 = vmmov 0   ;;  %p910_p11 = scmp.ne.s32.totalorder %s706_s21, %s909_s26 }
  0x15   : > { %s769_s24 = sshll.u32 %s136_s23, 3  ;;  %882 = vset.pattern.permute.xlu1 %v971_v33  ;;  %v1103_v53 = vld [vmem:[%s1222_s1 + $0x58] sm:$0xff]  ;;  %v1110_v58 = vld [vmem:[%s1222_s1 + $0x48] sm:$0xff]  ;;  %vm689_vm3 = vcmask 58368  }
  0x16   : > { %s138_s27 = scalar_lea.vmem %s1221_s0, %s769_s24  ;;  %p911_p12 = pnand %p910_p11, %p1033_p5 }
  0x17   : > { %v139_v1 = vld [vmem:[%s138_s27] sm:$0xff]  ;;  %s979_s27 = smov [#allocation2]  }
  0x18   : > { %801 = vmatprep.subr.mxu0 %v139_v1  ;;  %p912_p13 = pneg %p911_p12  ;;  %s913_s28 = sshll.u32 %s979_s27, 4  ;;  %s914_s28 = int_to_ptr.vmem [resolvable:$false] %s913_s28 }
  0x19   : > { %802 = vmatpush3.msra.mxu0 %v139_v1  ;;  %p916_p0 = scmp.lt.s32.totalorder %s706_s21, %s914_s28 }
  0x1a   : > { %804 = vmatmul.mubr.msk.f32.vlgmr.msra.gmra.mxu0 %vm148_vm0, %v141_v2 }
  0x1b   : > { %806 = vmatprep.mubr.msk.f32.mxu0 %vm148_vm0, %v142_v3 }
  0x1e   : > { %807 = vmatmul.mubr.msk.f32.gmra.mxu0 %vm148_vm0, %v143_v4 }
  0xda   : > { %v1064_v5 = vpop.f32.mrf.mxu0 }
  0xdb   : > { %v249_v6 = vsel %vm148_vm0, %v1064_v5, 0.0 }
  0xdc   : > { %250 = vadd.xlane.f32.xlu1 %v249_v6  ;;  %v1068_v7 = vpop.f32.mrf.mxu0 }
  0xdd   : > { %v246_v9 = vsel %vm148_vm0, %v1068_v7, 0.0 }
  0xde   : > { %v1070_v8 = vpop.f32.mrf.mxu0 }
  0xdf   : > { %v255_v10 = vsel %vm148_vm0, %v1070_v8, 0.0 }
  0xe0   : > { %247 = vadd.xlane.f32.xlu1 %v246_v9  ;;  %256 = vadd.xlane.f32.xlu0 %v255_v10  ;;  %v1076_v11 = vpop.f32.mrf.mxu0  ;;  %v375_v10 = vld [vmem:[%s1222_s1 + $0x20] sm:$0xff] }
  0xe1   : > { %v252_v12 = vsel %vm148_vm0, %v1076_v11, 0.0  ;;  %817 = vmatprep.mubr.msk.f32.mxu1 %vm379_vm1, %v375_v10 }
  0xe4   : > { %253 = vadd.xlane.f32.xlu0 %v252_v12 }
 0x165   : > { %v251_v13 = vpop.xlane.xlu1 %250 }
 0x166   : > { %v260_v14 = vmul.f32 0.125, %v251_v13 }
 0x168   : > { %v264_v18 = vsub.f32 %v1064_v5, %v260_v14 }
 0x169   : > { %v248_v15 = vpop.xlane.xlu1 %247  ;;  %v257_v16 = vpop.xlane.xlu0 %256 }
 0x16a   : > { %v262_v17 = vmul.f32 0.125, %v257_v16  ;;  %v259_v19 = vmul.f32 0.125, %v248_v15  ;;  %v268_v27 = vmul.f32 %v264_v18, %v264_v18 }
 0x16c   : > { %v266_v20 = vsub.f32 %v1070_v8, %v262_v17  ;;  %v263_v24 = vsub.f32 %v1068_v7, %v259_v19  ;;  %v274_v29 = vsel %vm148_vm0, %v268_v27, 0.0 }
 0x16d   : > { %v254_v21 = vpop.xlane.xlu0 %253 }
 0x16e   : > { %v261_v22 = vmul.f32 0.125, %v254_v21  ;;  %v270_v23 = vmul.f32 %v266_v20, %v266_v20  ;;  %v267_v31 = vmul.f32 %v263_v24, %v263_v24 }
 0x170   : > { %v265_v25 = vsub.f32 %v1076_v11, %v261_v22  ;;  %v280_v26 = vsel %vm148_vm0, %v270_v23, 0.0  ;;  %v271_v32 = vsel %vm148_vm0, %v267_v31, 0.0 }
 0x171   : > { %281 = vadd.xlane.f32.xlu0 %v280_v26 }
 0x172   : > { %v269_v28 = vmul.f32 %v265_v25, %v265_v25 }
 0x174   : > { %v277_v30 = vsel %vm148_vm0, %v269_v28, 0.0 }
 0x175   : > { %275 = vadd.xlane.f32.xlu0 %v274_v29  ;;  %278 = vadd.xlane.f32.xlu1 %v277_v30 }
 0x179   : > { %272 = vadd.xlane.f32.xlu1 %v271_v32 }
 0x1fa   : > { %v282_v34 = vpop.xlane.xlu0 %281 }
 0x1fb   : > { %v286_v35 = vmul.f32 0.125, %v282_v34 }
 0x1fd   : > { %v290_v36 = vadd.f32 1e-05, %v286_v35 }
 0x1fe   : > { %v279_v37 = vpop.xlane.xlu1 %278  ;;  %v276_v38 = vpop.xlane.xlu0 %275 }
 0x1ff   : > { %891 = vrsqrt.f32 %v290_v36  ;;  %v285_v39 = vmul.f32 0.125, %v279_v37  ;;  %v284_v40 = vmul.f32 0.125, %v276_v38 }
 0x201   : > { %v289_v41 = vadd.f32 1e-05, %v285_v39  ;;  %v288_v42 = vadd.f32 1e-05, %v284_v40 }
 0x202   : > { %v273_v43 = vpop.xlane.xlu1 %272 }
 0x203   : > { %893 = vrsqrt.f32 %v289_v41  ;;  %v283_v44 = vmul.f32 0.125, %v273_v43 }
 0x204   : > { %895 = vrsqrt.f32 %v288_v42 }
 0x205   : > { %v287_v45 = vadd.f32 1e-05, %v283_v44 }
 0x207   : > { %897 = vrsqrt.f32 %v287_v45 }
 0x20c   : > { %v892_v47 = vpop.eup %891 }
 0x20d   : > { %v298_v48 = vmul.f32 %v892_v47, %v1091_v46 }
 0x20f   : > { %v302_v49 = vmul.f32 %v298_v48, %v262_v17 }
 0x210   : > { %v894_v51 = vpop.eup %893 }
 0x211   : > { %v896_v52 = vpop.eup %895  ;;  %313 = vrot.lane.b32.xlu0 %v302_v49, %s972_s16  ;;  %v297_v56 = vmul.f32 %v894_v51, %v1103_v53 }
 0x212   : > { %v296_v54 = vmul.f32 %v896_v52, %v1097_v50 }
 0x213   : > { %v301_v59 = vmul.f32 %v297_v56, %v261_v22 }
 0x214   : > { %v300_v55 = vmul.f32 %v296_v54, %v260_v14  ;;  %v898_v57 = vpop.eup %897 }
 0x215   : > { %340 = vperm.xlu0 %881, %v298_v48   ;;  %v295_v60 = vmul.f32 %v898_v57, %v1110_v58 }
 0x216   : > { %309 = vrot.lane.b32.xlu1 %v300_v55, %s972_s16 }
 0x217   : > { %v299_v61 = vmul.f32 %v295_v60, %v259_v19 }
 0x219   : > { %330 = vperm.xlu0 %881, %v296_v54  }
 0x21a   : > { %311 = vrot.lane.b32.xlu1 %v301_v59, %s972_s16 }
 0x21d   : > { %325 = vperm.xlu0 %881, %v295_v60  }
 0x21e   : > { %307 = vrot.lane.b32.xlu1 %v299_v61, %s972_s16 }
 0x221   : > { %884 = vset.pattern.permute.xlu0 %v973_v62 }
 0x222   : > { %335 = vperm.xlu1 %882, %v297_v56  }
 0x226   : > { %883 = vset.pattern.permute.xlu1 %v973_v62 }
 0x283   : > { %v314_v63 = vpop.permute.xlu0 %313 }
 0x284   : > { %v322_v0 = vsub.f32 %v1091_v46, %v314_v63  ;;  %v974_v63 = vmov 2  }
 0x286   : > { %364 = vperm.xlu1 %883, %v322_v0  }
 0x288   : > { %v310_v1 = vpop.permute.xlu1 %309 }
 0x289   : > { %v320_v6 = vsub.f32 %v1097_v50, %v310_v1 }
 0x28c   : > { %v312_v2 = vpop.permute.xlu1 %311 }
 0x28d   : > { %v321_v3 = vsub.f32 %v1103_v53, %v312_v2 }
 0x28f   : > { %359 = vperm.xlu1 %883, %v321_v3  }
 0x290   : > { %v308_v4 = vpop.permute.xlu1 %307  ;;  %v341_v12 = vpop.permute.xlu0 %340 }
 0x291   : > { %v319_v9 = vsub.f32 %v1110_v58, %v308_v4  ;;  %v346_v14 = vmul.f32 %v1070_v8, %v341_v12 }
 0x293   : > { %349 = vperm.xlu0 %884, %v319_v9   ;;  %354 = vperm.xlu1 %883, %v320_v6  }
 0x294   : > { %v331_v17 = vpop.permute.xlu0 %330 }
 0x295   : > { %v344_v23 = vmul.f32 %v1064_v5, %v331_v17  ;;  %v377_v5 = vld [vmem:[%s1222_s1 + $0x30] sm:$0xff] }
 0x297   : > { %885 = vset.pattern.permute.xlu0 %v974_v63  ;;  %886 = vset.pattern.permute.xlu1 %v974_v63 }
 0x298   : > { %v326_v20 = vpop.permute.xlu0 %325 }
 0x299   : > { %v343_v24 = vmul.f32 %v326_v20, %v1068_v7  ;;  %v378_v7 = vld [vmem:[%s1222_s1 + $0x38] sm:$0xff] }
 0x29d   : > { %v336_v13 = vpop.permute.xlu1 %335 }
 0x29e   : > { %v345_v19 = vmul.f32 %v336_v13, %v1076_v11  ;;  %v376_v11 = vld [vmem:[%s1222_s1 + $0x28] sm:$0xff] }
 0x301   : > { %v365_v15 = vpop.permute.xlu1 %364 }
 0x302   : > { %v370_v16 = vadd.f32 %v365_v15, %v346_v14 }
 0x304   : > { %v374_v18 = vmax.f32 %v370_v16, 0.0 }
 0x306   : > { %809 = vmatprep.subr.mxu1 %v374_v18 }
 0x307   : > { %810 = vmatpush3.msra.mxu1 %v374_v18 }
 0x30a   : > { %v360_v21 = vpop.permute.xlu1 %359 }
 0x30b   : > { %v369_v22 = vadd.f32 %v360_v21, %v345_v19 }
 0x30d   : > { %v373_v25 = vmax.f32 %v369_v22, 0.0 }
 0x30e   : > { %v355_v26 = vpop.permute.xlu1 %354  ;;  %v350_v27 = vpop.permute.xlu0 %349 }
 0x30f   : > { %v368_v28 = vadd.f32 %v355_v26, %v344_v23  ;;  %v367_v8 = vadd.f32 %v350_v27, %v343_v24  ;;  %811 = vmatprep.subr.mxu1 %v373_v25 }
 0x310   : > { %812 = vmatpush3.msra.mxu1 %v373_v25 }
 0x311   : > { %v372_v29 = vmax.f32 %v368_v28, 0.0  ;;  %v371_v30 = vmax.f32 %v367_v8, 0.0  ;;  %v975_v28 = vmov 3  }
 0x313   : > { %813 = vmatprep.subr.mxu1 %v372_v29 }
 0x314   : > { %814 = vmatpush3.msra.mxu1 %v372_v29 }
 0x315   : > { %815 = vmatprep.subr.mxu1 %v371_v30 }
 0x316   : > { %816 = vmatpush3.msra.mxu1 %v371_v30  ;;  %v976_v30 = vmov 0.0  }
 0x317   : > { %818 = vmatmul.mubr.msk.f32.vlgmr.msra.gmra.mxu1 %vm379_vm1, %v376_v11  ;;  %823 = vmatprep.subr.mxu0 %v976_v30 }
 0x318   : > { %820 = vmatprep.mubr.msk.f32.mxu1 %vm379_vm1, %v377_v5  ;;  %831 = vmatprep.mubr.msk.f32.mxu0 %vm977_vm2, %v976_v30 }
 0x31b   : > { %821 = vmatmul.mubr.msk.f32.gmra.mxu1 %vm379_vm1, %v378_v7 }
 0x3d7   : > { %v1140_v31 = vpop.f32.mrf.mxu1 }
 0x3d8   : > { %v480_v38 = vsel %vm148_vm0, %v1140_v31, 0.0 }
 0x3d9   : > { %v1142_v32 = vpop.f32.mrf.mxu1 }
 0x3da   : > { %v477_v37 = vsel %vm148_vm0, %v1142_v32, 0.0 }
 0x3db   : > { %v1144_v33 = vpop.f32.mrf.mxu1 }
 0x3dc   : > { %v486_v34 = vsel %vm148_vm0, %v1144_v33, 0.0 }
 0x3dd   : > { %487 = vadd.xlane.f32.xlu1 %v486_v34  ;;  %v1148_v35 = vpop.f32.mrf.mxu1 }
 0x3de   : > { %v483_v36 = vsel %vm148_vm0, %v1148_v35, 0.0 }
 0x3df   : > { %484 = vadd.xlane.f32.xlu0 %v483_v36 }
 0x3e1   : > { %478 = vadd.xlane.f32.xlu1 %v477_v37 }
 0x3e3   : > { %481 = vadd.xlane.f32.xlu0 %v480_v38  ;;  %v978_v38 = vmov 4  }
 0x466   : > { %v488_v39 = vpop.xlane.xlu1 %487 }
 0x467   : > { %v492_v40 = vmul.f32 0.125, %v488_v39 }
 0x468   : > { %v485_v41 = vpop.xlane.xlu0 %484 }
 0x469   : > { %v496_v42 = vsub.f32 %v1144_v33, %v492_v40  ;;  %v491_v43 = vmul.f32 0.125, %v485_v41 }
 0x46a   : > { %v479_v44 = vpop.xlane.xlu1 %478 }
 0x46b   : > { %v495_v45 = vsub.f32 %v1148_v35, %v491_v43  ;;  %v489_v47 = vmul.f32 0.125, %v479_v44  ;;  %v500_v48 = vmul.f32 %v496_v42, %v496_v42 }
 0x46c   : > { %v482_v49 = vpop.xlane.xlu0 %481 }
 0x46d   : > { %v493_v51 = vsub.f32 %v1142_v32, %v489_v47  ;;  %v490_v52 = vmul.f32 0.125, %v482_v49  ;;  %v510_v54 = vsel %vm148_vm0, %v500_v48, 0.0  ;;  %v499_v55 = vmul.f32 %v495_v45, %v495_v45 }
 0x46e   : > { %511 = vadd.xlane.f32.xlu0 %v510_v54 }
 0x46f   : > { %v494_v56 = vsub.f32 %v1140_v31, %v490_v52  ;;  %v507_v57 = vsel %vm148_vm0, %v499_v55, 0.0  ;;  %v497_v59 = vmul.f32 %v493_v51, %v493_v51 }
 0x470   : > { %508 = vadd.xlane.f32.xlu1 %v507_v57 }
 0x471   : > { %v498_v60 = vmul.f32 %v494_v56, %v494_v56  ;;  %v501_v61 = vsel %vm148_vm0, %v497_v59, 0.0 }
 0x473   : > { %v504_v62 = vsel %vm148_vm0, %v498_v60, 0.0 }
 0x474   : > { %502 = vadd.xlane.f32.xlu1 %v501_v61  ;;  %505 = vadd.xlane.f32.xlu0 %v504_v62 }
 0x4f7   : > { %v512_v0 = vpop.xlane.xlu0 %511 }
 0x4f8   : > { %v516_v1 = vmul.f32 0.125, %v512_v0 }
 0x4f9   : > { %v509_v2 = vpop.xlane.xlu1 %508 }
 0x4fa   : > { %v520_v3 = vadd.f32 1e-05, %v516_v1  ;;  %v515_v4 = vmul.f32 0.125, %v509_v2 }
 0x4fc   : > { %899 = vrsqrt.f32 %v520_v3  ;;  %v519_v10 = vadd.f32 1e-05, %v515_v4 }
 0x4fd   : > { %v503_v6 = vpop.xlane.xlu1 %502  ;;  %v506_v9 = vpop.xlane.xlu0 %505 }
 0x4fe   : > { %v514_v12 = vmul.f32 0.125, %v506_v9  ;;  %v513_v13 = vmul.f32 0.125, %v503_v6  ;;  %901 = vrsqrt.f32 %v519_v10 }
 0x500   : > { %v518_v14 = vadd.f32 1e-05, %v514_v12  ;;  %v517_v15 = vadd.f32 1e-05, %v513_v13 }
 0x502   : > { %903 = vrsqrt.f32 %v518_v14 }
 0x503   : > { %905 = vrsqrt.f32 %v517_v15 }
 0x509   : > { %v900_v16 = vpop.eup %899 }
 0x50a   : > { %v528_v17 = vmul.f32 %v900_v16, %v1091_v46 }
 0x50b   : > { %v902_v19 = vpop.eup %901 }
 0x50c   : > { %v532_v18 = vmul.f32 %v528_v17, %v492_v40  ;;  %v527_v23 = vmul.f32 %v902_v19, %v1103_v53 }
 0x50e   : > { %543 = vrot.lane.b32.xlu0 %v532_v18, %s972_s16  ;;  %v531_v25 = vmul.f32 %v527_v23, %v491_v43 }
 0x50f   : > { %v904_v20 = vpop.eup %903 }
 0x510   : > { %v526_v21 = vmul.f32 %v904_v20, %v1097_v50  ;;  %v906_v24 = vpop.eup %905 }
 0x511   : > { %v525_v26 = vmul.f32 %v906_v24, %v1110_v58 }
 0x512   : > { %570 = vperm.xlu0 %885, %v528_v17   ;;  %v530_v22 = vmul.f32 %v526_v21, %v490_v52 }
 0x513   : > { %v529_v27 = vmul.f32 %v525_v26, %v489_v47 }
 0x514   : > { %539 = vrot.lane.b32.xlu1 %v530_v22, %s972_s16 }
 0x516   : > { %560 = vperm.xlu0 %885, %v526_v21  }
 0x518   : > { %541 = vrot.lane.b32.xlu1 %v531_v25, %s972_s16 }
 0x51a   : > { %555 = vperm.xlu0 %885, %v525_v26  }
 0x51c   : > { %537 = vrot.lane.b32.xlu1 %v529_v27, %s972_s16  ;;  %s780_s16 = sshll.u32 %s1016_s13, 5  ;;  %s915_s13 = scalar_lea.vmem %s914_s28, 64 }
 0x51d   : > { %s703_s24 = scalar_lea.hbm %s1223_s2, %s780_s16  ;;  %p917_p1 = scmp.lt.s32.totalorder %s915_s13, %s909_s26 }
 0x51e   : > { %888 = vset.pattern.permute.xlu0 %v975_v28 }
 0x51f   : > { %p918_p2 = por %p917_p1, %p916_p0 }
 0x520   : > { %565 = vperm.xlu1 %886, %v527_v23  }
 0x521   : > { %p919_p3 = pnand %p918_p2, %p912_p13 }
 0x524   : > { %887 = vset.pattern.permute.xlu1 %v975_v28 }
 0x580   : > { %v544_v8 = vpop.permute.xlu0 %543 }
 0x581   : > { %v552_v29 = vsub.f32 %v1091_v46, %v544_v8  ;;  %v606_v46 = vld [vmem:[%s1222_s1 + $0x48] sm:$0x3] }
 0x583   : > { %594 = vperm.xlu1 %887, %v552_v29  }
 0x586   : > { %v540_v11 = vpop.permute.xlu1 %539 }
 0x587   : > { %v550_v36 = vsub.f32 %v1097_v50, %v540_v11 }
 0x58a   : > { %v542_v5 = vpop.permute.xlu1 %541 }
 0x58b   : > { %v551_v7 = vsub.f32 %v1103_v53, %v542_v5 }
 0x58d   : > { %589 = vperm.xlu1 %887, %v551_v7   ;;  %v571_v39 = vpop.permute.xlu0 %570 }
 0x58e   : > { %v538_v34 = vpop.permute.xlu1 %537  ;;  %v576_v40 = vmul.f32 %v1144_v33, %v571_v39 }
 0x58f   : > { %v549_v37 = vsub.f32 %v1110_v58, %v538_v34 }
 0x591   : > { %579 = vperm.xlu0 %888, %v549_v37   ;;  %584 = vperm.xlu1 %887, %v550_v36   ;;  %v561_v58 = vpop.permute.xlu0 %560 }
 0x592   : > { %v574_v48 = vmul.f32 %v1140_v31, %v561_v58 }
 0x595   : > { %889 = vset.pattern.permute.xlu1 %v978_v38  ;;  %890 = vset.pattern.permute.xlu0 %v978_v38  ;;  %v556_v44 = vpop.permute.xlu0 %555 }
 0x596   : > { %609 = vperm.xlu1 %889, %v606_v46   ;;  %v573_v49 = vmul.f32 %v556_v44, %v1142_v32 }
 0x59b   : > { %v566_v53 = vpop.permute.xlu1 %565 }
 0x59c   : > { %v575_v43 = vmul.f32 %v566_v53, %v1148_v35  ;;  %v605_v35 = vld [vmem:[%s1222_s1 + $0x40] sm:$0x3] }
 0x5fe   : > { %v595_v41 = vpop.permute.xlu1 %594 }
 0x5ff   : > { %v600_v50 = vadd.f32 %v595_v41, %v576_v40 }
 0x601   : > { %v604_v42 = vmax.f32 %v600_v50, 0.0 }
 0x603   : > { %824 = vmatpush3.msra.mxu0 %v604_v42 }
 0x604   : > { %825 = vmatprep.subr.mxu0 %v976_v30 }
 0x608   : > { %v590_v45 = vpop.permute.xlu1 %589 }
 0x609   : > { %v599_v47 = vadd.f32 %v590_v45, %v575_v43 }
 0x60b   : > { %v603_v51 = vmax.f32 %v599_v47, 0.0 }
 0x60c   : > { %v585_v52 = vpop.permute.xlu1 %584  ;;  %v580_v54 = vpop.permute.xlu0 %579 }
 0x60d   : > { %v598_v55 = vadd.f32 %v585_v52, %v574_v48  ;;  %v597_v33 = vadd.f32 %v580_v54, %v573_v49  ;;  %826 = vmatpush3.msra.mxu0 %v603_v51 }
 0x60e   : > { %827 = vmatprep.subr.mxu0 %v976_v30 }
 0x60f   : > { %v602_v56 = vmax.f32 %v598_v55, 0.0  ;;  %v601_v57 = vmax.f32 %v597_v33, 0.0 }
 0x611   : > { %828 = vmatpush3.msra.mxu0 %v602_v56  ;;  %v610_v31 = vpop.permute.xlu1 %609 }
 0x612   : > { %829 = vmatprep.subr.mxu0 %v976_v30 }
 0x613   : > { %830 = vmatpush3.msra.mxu0 %v601_v57 }
 0x614   : > { %832 = vmatmul.mubr.msk.f32.vlgmr.msra.gmra.mxu0 %vm379_vm1, %v605_v35 }
 0x6d4   : > { %v681_v32 = vpop.f32.mrf.mxu0 }
 0x6d5   : > { %v682_v59 = vadd.f32 %v681_v32, %v610_v31 }
 0x6d6   : > { %v833_v60 = vpop.f32.mrf.mxu0 }
 0x6d7   : > { %v685_v61 = vmul.f32 0.5, %v682_v59 }
 0x6d9   : > { %907 = vtanh.f32 %v685_v61 }
 0x6e6   : > { %v908_v62 = vpop.eup %907 }
 0x6e7   : > { %v687_v63 = vadd.f32 1.0, %v908_v62 }
 0x6e9   : > { %v688_v0 = vmul.f32 0.5, %v687_v63 }
 0x6eb   : > { %690 = vst.msk [vmem:[%s134_s17] sm:$0x3] %vm689_vm3, %v688_v0 }
 0x6ec   : > { %922 = shalt.err (!%p919_p3)
}
 0x6ed   : > { %s923_s29 = scalar_lea.hbm %s703_s24, 32  ;;  %s927_s4 = scalar_lea.hbm %s1223_s2, 64 }
 0x6ee   : > { %p924_p4 = scmp.ne.s32.totalorder %s703_s24, %s923_s29  ;;  %p928_p9 = scmp.lt.s32.totalorder %s703_s24, %s1223_s2 }
 0x6ef   : > { %p929_p10 = scmp.lt.s32.totalorder %s927_s4, %s923_s29 }
 0x6f0   : > { %p925_p7 = pnand %p924_p4, %p1033_p5 }
 0x6f1   : > { %p930_p11 = por %p929_p10, %p928_p9 }
 0x6f2   : > { %p926_p8 = pneg %p925_p7 }
 0x6f4   : > { %p931_p12 = pnand %p930_p11, %p926_p8 }
 0x6f6   : > { %934 = shalt.err (!%p931_p12)
}
 0x6f7   : > { %834 = dma.vmem_to_hbm [thread:$0]  (%p1033_p5), %s706_s21, 32, %s703_s24, %s692_s25  }
 0x6f8 PF: > { %p840_p13 = scmp.ge.s32.totalorder %s969_s12, 2  ;;  %s717_s7 = sand.u32 1, %s957_s9  }
 0x6f9   : > { %s718_s8 = scalar_lea.sflag [#allocation3], %s717_s7 }
 0x6fa   : > { %p837_p0 = pnand %p840_p13, %p1037_p6 }
 0x6fc   : > { %p838_p1 = pneg %p837_p0 }
 0x6fe   : > { %952 = dma.done.wait (%p838_p1), %s718_s8, 32  }
 0x6ff   : > { %954 = vsyncadd (%p838_p1), %s718_s8, 4294967264  ;;  %p12_p2 = scmp.ge.s32.totalorder %s1020_s15, 4   ;;  %s1226_s9 = smov %s961_s10 }
 0x700   : > { %s1227_s10 = smov %s965_s11  ;;  %s1228_s11 = smov %s1031_s18 }
 0x701   : > { %s1229_s12 = smov %s1020_s15  ;;  %14 = sbr.rel (!%p12_p2) target bundleno = 3 (0x3), region = 63 }
 0x706   :  { %723 = vsyncpa [#allocation3], 1 }
 0x707   :  { %725 = vsyncpa [#allocation3 + $0x1], 1 }

</bundles_post_ra>
